<compile_context>
chip_gen: v7x
topology: tpu7x:2x2x1
jax: 0.10.0
libtpu: 0.0.40
codegen_flags: <defaults>
</compile_context>

<pallas_src>
import jax
import jax.numpy as jnp
from jax.experimental import pallas as pl
from jax.experimental.pallas import tpu as pltpu

# Synthetic config values (the PyTorch module reads these from `conf`).
HORIZON = 8                      # input is alphas + previous action -> HORIZON + 1
ACTION_SPACE = 3                 # output dimension (trade signal)
LAYER_SIZES = [64, 32]           # hidden layer sizes

INPUT_DIM = HORIZON + 1

# Batch tile for the gridded wrapper (fp32 sublane multiple of 8).
MAX_BATCH_TILE = 256


def _dqn_fused_kernel(x_ref, *refs):
    """refs = (w0, b0, w1, b1, ..., wN, bN, o_ref).

    Weights are (Fin, Fout); biases are (1, Fout).
    ReLU after every layer except the last, sigmoid on the last
    (matches the PyTorch forward exactly).
    """
    o_ref = refs[-1]
    wb = refs[:-1]
    n_layers = len(wb) // 2

    h = x_ref[...]
    for i in range(n_layers):
        w = wb[2 * i][...]
        b = wb[2 * i + 1][...]
        h = jnp.dot(h, w, preferred_element_type=jnp.float32) + b
        if i < n_layers - 1:
            h = jnp.maximum(h, 0.0)                 # ReLU (VPU)
        else:
            h = 1.0 / (1.0 + jnp.exp(-h))           # sigmoid (EUP exp + divide)
    o_ref[...] = h.astype(o_ref.dtype)


def dqn_forward_pallas(x, params):
    """Fused forward pass.

    Args:
      x: (B, INPUT_DIM) float32.
      params: list of (w, b) with w: (Fin, Fout), b: (1, Fout).
    Returns:
      (B, ACTION_SPACE) float32.
    """
    B, fin0 = x.shape
    fout_last = params[-1][0].shape[1]

    # Batch tiling: one tile if the batch is small, otherwise stream 256-row
    # tiles with the (tiny) parameters resident in VMEM across all tiles.
    tile = B if B <= MAX_BATCH_TILE else MAX_BATCH_TILE
    grid = (pl.cdiv(B, tile),)

    in_specs = [pl.BlockSpec((tile, fin0), lambda i: (i, 0))]
    flat_params = []
    flops = 0
    param_bytes = 0
    for (w, b) in params:
        fin, fout = w.shape
        # Constant index_map -> weights/biases are DMA'd once and stay resident.
        in_specs.append(pl.BlockSpec((fin, fout), lambda i: (0, 0)))
        in_specs.append(pl.BlockSpec((1, fout), lambda i: (0, 0)))
        flat_params.extend([w, b])
        flops += 2 * B * fin * fout + B * fout
        param_bytes += (fin * fout + fout) * 4

    out_specs = pl.BlockSpec((tile, fout_last), lambda i: (i, 0))

    cost = pl.CostEstimate(
        flops=flops,
        transcendentals=B * fout_last,                      # exp in sigmoid
        bytes_accessed=param_bytes + 4 * B * (fin0 + fout_last),
    )

    return pl.pallas_call(
        _dqn_fused_kernel,
        out_shape=jax.ShapeDtypeStruct((B, fout_last), x.dtype),
        grid=grid,
        in_specs=in_specs,
        out_specs=out_specs,
        compiler_params=pltpu.CompilerParams(
            dimension_semantics=("parallel",)),
        cost_estimate=cost,
    )(x, *flat_params)


def init_params(key, layer_sizes):
    """PyTorch-Linear-style init U(-1/sqrt(fan_in), 1/sqrt(fan_in)).

    Weights are stored pre-transposed as (Fin, Fout); biases as (1, Fout).
    """
    dims = [INPUT_DIM] + list(layer_sizes) + [ACTION_SPACE]
    params = []
    for i in range(len(dims) - 1):
        fan_in, fan_out = dims[i], dims[i + 1]
        key, kw, kb = jax.random.split(key, 3)
        bound = 1.0 / jnp.sqrt(jnp.float32(fan_in))
        w = jax.random.uniform(kw, (fan_in, fan_out), jnp.float32, -bound, bound)
        b = jax.random.uniform(kb, (1, fan_out), jnp.float32, -bound, bound)
        params.append((w, b))
    return params


@jax.jit
def dqn_forward(x, params_flat):
    params = [(params_flat[2 * i], params_flat[2 * i + 1])
              for i in range(len(params_flat) // 2)]
    return dqn_forward_pallas(x, params)


def dqn_reference(x, params_flat):
    params = [(params_flat[2 * i], params_flat[2 * i + 1])
              for i in range(len(params_flat) // 2)]
    h = x
    for w, b in params[:-1]:
        h = jnp.maximum(h @ w + b, 0.0)
    w, b = params[-1]
    z = h @ w + b
    return 1.0 / (1.0 + jnp.exp(-z))


if __name__ == "__main__":
    key = jax.random.PRNGKey(0)
    key, kx, kx2 = jax.random.split(key, 3)

    params = init_params(key, LAYER_SIZES)
    params_flat = tuple(p for wb in params for p in wb)

    # Small demo batch (single tile, single grid step).
    batch = 8
    x = jax.random.normal(kx, (batch, INPUT_DIM), jnp.float32)
    out = jax.block_until_ready(dqn_forward(x, params_flat))
    ref = dqn_reference(x, params_flat)
    assert out.shape == (batch, ACTION_SPACE), out.shape
    assert bool(jnp.all((out >= 0.0) & (out <= 1.0))), "sigmoid range violated"
    assert jnp.allclose(out, ref, atol=1e-5, rtol=1e-5), "mismatch vs reference"

    # Larger batch to exercise the gridded (multi-tile, parallel) path.
    batch2 = 512
    x2 = jax.random.normal(kx2, (batch2, INPUT_DIM), jnp.float32)
    out2 = jax.block_until_ready(dqn_forward(x2, params_flat))
    ref2 = dqn_reference(x2, params_flat)
    assert out2.shape == (batch2, ACTION_SPACE), out2.shape
    assert jnp.allclose(out2, ref2, atol=1e-5, rtol=1e-5), "mismatch vs reference (gridded)"

    print("KERNEL_OK")
</pallas_src>

<mosaic_0001>
module attributes {stable_mosaic.version = 11 : i64} {
  func.func @_dqn_fused_kernel(%arg0: i32, %arg1: memref<8x9xf32, #tpu.memory_space<vmem>>, %arg2: memref<9x64xf32, #tpu.memory_space<vmem>>, %arg3: memref<1x64xf32, #tpu.memory_space<vmem>>, %arg4: memref<64x32xf32, #tpu.memory_space<vmem>>, %arg5: memref<1x32xf32, #tpu.memory_space<vmem>>, %arg6: memref<32x3xf32, #tpu.memory_space<vmem>>, %arg7: memref<1x3xf32, #tpu.memory_space<vmem>>, %arg8: memref<8x3xf32, #tpu.memory_space<vmem>>) attributes {dimension_semantics = [#tpu.dimension_semantics<parallel>], iteration_bounds = array<i64: 1>, scalar_prefetch = 0 : i64, scratch_operands = 0 : i64, tpu.core_type = #tpu.core_type<tc>, window_params = [{transform_indices = @transform_0, window_bounds = array<i64: 8, 9>}, {pipeline_mode = #tpu.pipeline_mode<synchronous>, transform_indices = @transform_1, window_bounds = array<i64: 9, 64>}, {pipeline_mode = #tpu.pipeline_mode<synchronous>, transform_indices = @transform_2, window_bounds = array<i64: 1, 64>}, {pipeline_mode = #tpu.pipeline_mode<synchronous>, transform_indices = @transform_3, window_bounds = array<i64: 64, 32>}, {pipeline_mode = #tpu.pipeline_mode<synchronous>, transform_indices = @transform_4, window_bounds = array<i64: 1, 32>}, {pipeline_mode = #tpu.pipeline_mode<synchronous>, transform_indices = @transform_5, window_bounds = array<i64: 32, 3>}, {pipeline_mode = #tpu.pipeline_mode<synchronous>, transform_indices = @transform_6, window_bounds = array<i64: 1, 3>}, {transform_indices = @transform_7, window_bounds = array<i64: 8, 3>}]} {
    %c0 = arith.constant 0 : index
    %c0_0 = arith.constant 0 : index
    %0 = vector.load %arg1[%c0, %c0_0] : memref<8x9xf32, #tpu.memory_space<vmem>>, vector<8x9xf32>
    %c0_1 = arith.constant 0 : index
    %c0_2 = arith.constant 0 : index
    %1 = vector.load %arg2[%c0_1, %c0_2] : memref<9x64xf32, #tpu.memory_space<vmem>>, vector<9x64xf32>
    %c0_3 = arith.constant 0 : index
    %c0_4 = arith.constant 0 : index
    %2 = vector.load %arg3[%c0_3, %c0_4] : memref<1x64xf32, #tpu.memory_space<vmem>>, vector<1x64xf32>
    %cst = arith.constant dense<0.000000e+00> : vector<8x64xf32>
    %3 = tpu.matmul %0, %1, %cst {dimension_numbers = #tpu.dot_dimension_numbers<[1], [0], [0], [1], [0, 0, 1, 1], [], []>} : vector<8x9xf32>, vector<9x64xf32>, vector<8x64xf32> -> vector<8x64xf32>
    %4 = vector.broadcast %2 : vector<1x64xf32> to vector<8x64xf32>
    %5 = arith.addf %3, %4 : vector<8x64xf32>
    %cst_5 = arith.constant 0.000000e+00 : f32
    %6 = vector.broadcast %cst_5 : f32 to vector<8x64xf32>
    %7 = arith.maximumf %5, %6 : vector<8x64xf32>
    %c0_6 = arith.constant 0 : index
    %c0_7 = arith.constant 0 : index
    %8 = vector.load %arg4[%c0_6, %c0_7] : memref<64x32xf32, #tpu.memory_space<vmem>>, vector<64x32xf32>
    %c0_8 = arith.constant 0 : index
    %c0_9 = arith.constant 0 : index
    %9 = vector.load %arg5[%c0_8, %c0_9] : memref<1x32xf32, #tpu.memory_space<vmem>>, vector<1x32xf32>
    %cst_10 = arith.constant dense<0.000000e+00> : vector<8x32xf32>
    %10 = tpu.matmul %7, %8, %cst_10 {dimension_numbers = #tpu.dot_dimension_numbers<[1], [0], [0], [1], [0, 0, 1, 1], [], []>} : vector<8x64xf32>, vector<64x32xf32>, vector<8x32xf32> -> vector<8x32xf32>
    %11 = vector.broadcast %9 : vector<1x32xf32> to vector<8x32xf32>
    %12 = arith.addf %10, %11 : vector<8x32xf32>
    %cst_11 = arith.constant 0.000000e+00 : f32
    %13 = vector.broadcast %cst_11 : f32 to vector<8x32xf32>
    %14 = arith.maximumf %12, %13 : vector<8x32xf32>
    %c0_12 = arith.constant 0 : index
    %c0_13 = arith.constant 0 : index
    %15 = vector.load %arg6[%c0_12, %c0_13] : memref<32x3xf32, #tpu.memory_space<vmem>>, vector<32x3xf32>
    %c0_14 = arith.constant 0 : index
    %c0_15 = arith.constant 0 : index
    %16 = vector.load %arg7[%c0_14, %c0_15] : memref<1x3xf32, #tpu.memory_space<vmem>>, vector<1x3xf32>
    %cst_16 = arith.constant dense<0.000000e+00> : vector<8x3xf32>
    %17 = tpu.matmul %14, %15, %cst_16 {dimension_numbers = #tpu.dot_dimension_numbers<[1], [0], [0], [1], [0, 0, 1, 1], [], []>} : vector<8x32xf32>, vector<32x3xf32>, vector<8x3xf32> -> vector<8x3xf32>
    %18 = vector.broadcast %16 : vector<1x3xf32> to vector<8x3xf32>
    %19 = arith.addf %17, %18 : vector<8x3xf32>
    %cst_17 = arith.constant 0.000000e+00 : f32
    %20 = vector.broadcast %cst_17 : f32 to vector<8x3xf32>
    %21 = arith.subf %20, %19 : vector<8x3xf32>
    %22 = math.exp %21 : vector<8x3xf32>
    %cst_18 = arith.constant 1.000000e+00 : f32
    %23 = vector.broadcast %cst_18 : f32 to vector<8x3xf32>
    %24 = arith.addf %23, %22 : vector<8x3xf32>
    %cst_19 = arith.constant 1.000000e+00 : f32
    %25 = vector.broadcast %cst_19 : f32 to vector<8x3xf32>
    %26 = arith.divf %25, %24 : vector<8x3xf32>
    %c0_20 = arith.constant 0 : index
    %c0_21 = arith.constant 0 : index
    %27 = vector.load %arg8[%c0_20, %c0_21] : memref<8x3xf32, #tpu.memory_space<vmem>>, vector<8x3xf32>
    tpu.vector_store %arg8[%c0_20, %c0_21], %26 {strides = array<i32>} : memref<8x3xf32, #tpu.memory_space<vmem>>, vector<8x3xf32>,
    return
  }
  func.func @transform_0(%arg0: i32) -> (i32, i32) {
    %c0_i32 = arith.constant 0 : i32
    %c0_i32_0 = arith.constant 0 : i32
    return %arg0, %c0_i32 : i32, i32
  }
  func.func @transform_1(%arg0: i32) -> (i32, i32) {
    %c0_i32 = arith.constant 0 : i32
    %c0_i32_0 = arith.constant 0 : i32
    %c0_i32_1 = arith.constant 0 : i32
    return %c0_i32, %c0_i32_0 : i32, i32
  }
  func.func @transform_2(%arg0: i32) -> (i32, i32) {
    %c0_i32 = arith.constant 0 : i32
    %c0_i32_0 = arith.constant 0 : i32
    %c0_i32_1 = arith.constant 0 : i32
    return %c0_i32, %c0_i32_0 : i32, i32
  }
  func.func @transform_3(%arg0: i32) -> (i32, i32) {
    %c0_i32 = arith.constant 0 : i32
    %c0_i32_0 = arith.constant 0 : i32
    %c0_i32_1 = arith.constant 0 : i32
    return %c0_i32, %c0_i32_0 : i32, i32
  }
  func.func @transform_4(%arg0: i32) -> (i32, i32) {
    %c0_i32 = arith.constant 0 : i32
    %c0_i32_0 = arith.constant 0 : i32
    %c0_i32_1 = arith.constant 0 : i32
    return %c0_i32, %c0_i32_0 : i32, i32
  }
  func.func @transform_5(%arg0: i32) -> (i32, i32) {
    %c0_i32 = arith.constant 0 : i32
    %c0_i32_0 = arith.constant 0 : i32
    %c0_i32_1 = arith.constant 0 : i32
    return %c0_i32, %c0_i32_0 : i32, i32
  }
  func.func @transform_6(%arg0: i32) -> (i32, i32) {
    %c0_i32 = arith.constant 0 : i32
    %c0_i32_0 = arith.constant 0 : i32
    %c0_i32_1 = arith.constant 0 : i32
    return %c0_i32, %c0_i32_0 : i32, i32
  }
  func.func @transform_7(%arg0: i32) -> (i32, i32) {
    %c0_i32 = arith.constant 0 : i32
    %c0_i32_0 = arith.constant 0 : i32
    return %arg0, %c0_i32 : i32, i32
  }
}

</mosaic_0001>

<bundles_post_ra>
// kernel: dqn_forward.1
= control target key start
LH: loop header
LB: loop body
LE: loop exit
PB: predicated region body
PF: predicated region fallthrough
CT: control target
= control target key end

     0   :  { %vm40_vm0 = vcmask 1040384   ;;  %v393_v0 = vmov 0.0|0.0   ;;  %vm394_vm1 = vmmov 1   ;;  %vm395_vm3 = vmmov 0   ;;  %s497_s1 = inlined_call_operand.vmem [shape: f32[9,64], index: 1, kind: input, shape index: {}]   ;;  %s498_s3 = inlined_call_operand.vmem [shape: f32[64,32], index: 3, kind: input, shape index: {}]   ;;  %s499_s0 = inlined_call_operand.vmem [shape: f32[8,9], index: 0, kind: input, shape index: {}]   ;;  %s500_s5 = inlined_call_operand.vmem [shape: f32[32,3], index: 5, kind: input, shape index: {}]   ;;  %s501_s2 = inlined_call_operand.vmem [shape: f32[1,64], index: 2, kind: input, shape index: {}]   ;;  %s502_s4 = inlined_call_operand.vmem [shape: f32[1,32], index: 4, kind: input, shape index: {}]   ;;  %s503_s6 = inlined_call_operand.vmem [shape: f32[1,3], index: 6, kind: input, shape index: {}]   ;;  %s504_s7 = inlined_call_operand.vmem [shape: f32[8,3], index: 7, kind: output, shape index: {}]  }
   0x1   :  { %363 = vmatprep.subr.bf16.mxu0 %v393_v0  ;;  %v27_v1 = vld [vmem:[%s497_s1] sm:$0xff]  ;;  %v28_v2 = vld [vmem:[%s497_s1 + $0x8] sm:$0x1]  ;;  %vm365_vm2 = vmpackc.low %vm40_vm0, %vm394_vm1  ;;  %367 = vmatprep.subr.bf16.mxu1 %v393_v0  ;;  %v396_v4 = vmov 0.0   ;;  %vm36_vm4 = vcmask 72704   ;;  %vm130_vm5 = vcmask 523264  }
   0x2   :  { %v364_v3 = vpack.c.bf16 %v28_v2, %v27_v1  ;;  %330 = vmatprep.mubr.msk.f32.mxu0 %vm395_vm3, %v396_v4  ;;  %v115_v5 = vld [vmem:[%s498_s3] sm:$0xff]  ;;  %v116_v6 = vld [vmem:[%s498_s3 + $0x8] sm:$0xff]  ;;  %349 = vmatprep.mubr.msk.f32.mxu1 %vm395_vm3, %v396_v4  ;;  %v117_v8 = vld [vmem:[%s498_s3 + $0x10] sm:$0xff]  ;;  %vm216_vm6 = vcmask 261120   ;;  %vm296_vm7 = vcmask 23552  }
   0x3   :  { %v368_v7 = vpack.c.bf16 %v116_v6, %v115_v5  ;;  %v118_v9 = vld [vmem:[%s498_s3 + $0x18] sm:$0xff]  ;;  %v26_v10 = vld [vmem:[%s499_s0] sm:$0xff]  ;;  %v120_v13 = vld [vmem:[%s498_s3 + $0x28] sm:$0xff] }
   0x4   :  { %366 = vmatpush3.bf16.msk.msra.mxu0 %vm365_vm2, %v364_v3  ;;  %v371_v11 = vpack.c.bf16 %v118_v9, %v117_v8  ;;  %v119_v12 = vld [vmem:[%s498_s3 + $0x20] sm:$0xff]  ;;  %v121_v15 = vld [vmem:[%s498_s3 + $0x30] sm:$0xff]  ;;  %v122_v16 = vld [vmem:[%s498_s3 + $0x38] sm:$0xff] }
   0x5   :  { %369 = vmatpush3.bf16.msra.mxu1 %v368_v7  ;;  %379 = vmatprep.subr.bf16.mxu0 %v393_v0  ;;  %v374_v14 = vpack.c.bf16 %v120_v13, %v119_v12  ;;  %v377_v17 = vpack.c.bf16 %v122_v16, %v121_v15  ;;  %v205_v18 = vld [vmem:[%s500_s5] sm:$0xff]  ;;  %v206_v19 = vld [vmem:[%s500_s5 + $0x8] sm:$0xff]  ;;  %v207_v26 = vld [vmem:[%s500_s5 + $0x10] sm:$0xff] }
   0x6   :  { %370 = vmatprep.subr.bf16.mxu1 %v393_v0  ;;  %v380_v20 = vpack.c.bf16 %v206_v19, %v205_v18  ;;  %v302_v21 = vld [vmem:[%s501_s2] ss:$0 sm:$0xff]  ;;  %v208_v27 = vld [vmem:[%s500_s5 + $0x18] sm:$0xff] }
   0x7   :  { %331 = vmatmul.mubr.msk.f32.vlgmr.msra.gmra.mrb[0].mxu0 %vm36_vm4, %v26_v10  ;;  %v383_v28 = vpack.c.bf16 %v208_v27, %v207_v26  ;;  %v305_v29 = vld [vmem:[%s502_s4] ss:$0 sm:$0xff] }
   0x8   :  { %360 = vmatprep.mubr.msk.f32.mxu0 %vm395_vm3, %v396_v4  ;;  %381 = vmatpush3.bf16.msra.mxu0 %v380_v20  ;;  %v307_v34 = vld [vmem:[%s503_s6] ss:$0 sm:$0xff] }
   0x9   :  { %372 = vmatpush3.bf16.msra.mxu1 %v371_v11  ;;  %382 = vmatprep.subr.bf16.mxu0 %v393_v0 }
   0xa   :  { %373 = vmatprep.subr.bf16.mxu1 %v393_v0 }
   0xc   :  { %384 = vmatpush3.bf16.msra.mxu0 %v383_v28 }
   0xd   :  { %375 = vmatpush3.bf16.msra.mxu1 %v374_v14 }
   0xe   :  { %376 = vmatprep.subr.bf16.mxu1 %v393_v0 }
  0x11   :  { %378 = vmatpush3.bf16.msra.mxu1 %v377_v17 }
  0xda   :  { %v110_v22 = vpop.f32.mrb[0].mxu0 }
  0xdb   :  { %v111_v23 = vadd.f32 %v302_v21, %v110_v22  ;;  %v332_v24 = vpop.f32.mrb[1].mxu0 }
  0xdd   :  { %v114_v25 = vmax.f32 %v111_v23, 0.0 }
  0xdf   :  { %350 = vmatmul.mubr.msk.f32.vlgmr.msra.gmra.mrb[0].mxu1 %vm130_vm5, %v114_v25 }
 0x1b2   :  { %v200_v30 = vpop.f32.mrb[0].mxu1 }
 0x1b3   :  { %v201_v31 = vadd.f32 %v305_v29, %v200_v30  ;;  %v351_v32 = vpop.f32.mrb[1].mxu1 }
 0x1b5   :  { %v204_v33 = vmax.f32 %v201_v31, 0.0 }
 0x1b7   :  { %361 = vmatmul.mubr.msk.f32.vlgmr.msra.gmra.mrb[2].mxu0 %vm216_vm6, %v204_v33 }
 0x28a   :  { %v286_v35 = vpop.f32.mrb[2].mxu0 }
 0x28b   :  { %v287_v36 = vadd.f32 %v307_v34, %v286_v35  ;;  %v362_v37 = vpop.f32.mrb[3].mxu0 }
 0x28d   :  { %v290_v38 = vsub.f32 0.0, %v287_v36 }
 0x28f   :  { %v291_v39 = vmul.f32 1.442695, %v290_v38 }
 0x291   :  { %389 = vpow2.f32 %v291_v39 }
 0x29b   :  { %v390_v40 = vpop.eup %389 }
 0x29c   :  { %v293_v41 = vadd.f32 1.0, %v390_v40 }
 0x29e   :  { %391 = vrcp.f32 %v293_v41 }
 0x2a8   :  { %v392_v42 = vpop.eup %391 }
 0x2a9   :  { %297 = vst.msk [vmem:[%s504_s7] sm:$0xff] %vm296_vm7, %v392_v42 }

</bundles_post_ra>
